<compile_context>
chip_gen: v5e
topology: v5e:2x2
jax: 0.10.0
libtpu: 0.0.40
codegen_flags: <defaults>
</compile_context>

<pallas_src>
import functools

import jax
import jax.numpy as jnp
from jax.experimental import pallas as pl
from jax.experimental.pallas import tpu as pltpu

_LANE = 128  # lane width; final output is padded to this many columns


def _mlp_kernel(x_ref, w_in_ref, b_in_ref, w_hid_ref, b_hid_ref,
                w_out_ref, b_out_ref, o_ref, *, hidden_layers: int):
    # x: (bt, IN)  w_in: (IN, H)  b_in: (1, H)
    # w_hid: (L, H, H)  b_hid: (L, 1, H)
    # w_out: (H, 128) zero-padded   b_out: (1, 128) zero-padded
    # o: (bt, 128) lane-dense (real result in column 0)
    h = jnp.dot(x_ref[...], w_in_ref[...], preferred_element_type=jnp.float32)
    h = jnp.maximum(h + b_in_ref[...], 0.0)
    # Static unroll over hidden layers; activation stays in registers.
    for i in range(hidden_layers):
        h = jnp.dot(h, w_hid_ref[i], preferred_element_type=jnp.float32)
        h = jnp.maximum(h + b_hid_ref[i], 0.0)
    y = jnp.dot(h, w_out_ref[...], preferred_element_type=jnp.float32)
    y = y + b_out_ref[...]
    o_ref[...] = y.astype(o_ref.dtype)


def mlp_forward(x, w_in, b_in, w_hid, b_hid, w_out, b_out, *, batch_tile=256):
    """Fused MLP forward.

    x:     (B, IN)
    w_in:  (IN, H),  b_in: (H,)
    w_hid: (L, H, H), b_hid: (L, H)   (L may be 0 -> pass zero dummies of L=1)
    w_out: (H, 1),   b_out: (1,)
    returns (B, 1)
    """
    B, IN = x.shape
    H = w_in.shape[1]
    L = int(w_hid.shape[0])
    n_hidden = L if b_hid.shape[0] == L else 0  # (defensive; L used below)

    # Host-side packing (once per call, negligible):
    b_in2 = b_in.reshape(1, H)
    b_hid2 = b_hid.reshape(L, 1, H)
    # Lane-dense padding of the 1-wide output projection.
    w_out_p = jnp.zeros((H, _LANE), x.dtype).at[:, :1].set(w_out)
    b_out_p = jnp.zeros((1, _LANE), x.dtype).at[:, :1].set(b_out.reshape(1, 1))

    kernel = functools.partial(_mlp_kernel, hidden_layers=L)
    args = (x, w_in, b_in2, w_hid, b_hid2, w_out_p, b_out_p)

    if B > batch_tile and B % batch_tile == 0:
        # Batch-tiled path: weights stay at block (0,0,...) (VMEM-resident),
        # batch axis marked "parallel" so v7x's 2 TensorCores split it.
        nb = B // batch_tile
        y_pad = pl.pallas_call(
            kernel,
            out_shape=jax.ShapeDtypeStruct((B, _LANE), x.dtype),
            grid=(nb,),
            in_specs=[
                pl.BlockSpec((batch_tile, IN), lambda i: (i, 0)),
                pl.BlockSpec((IN, H), lambda i: (0, 0)),
                pl.BlockSpec((1, H), lambda i: (0, 0)),
                pl.BlockSpec((L, H, H), lambda i: (0, 0, 0)),
                pl.BlockSpec((L, 1, H), lambda i: (0, 0, 0)),
                pl.BlockSpec((H, _LANE), lambda i: (0, 0)),
                pl.BlockSpec((1, _LANE), lambda i: (0, 0)),
            ],
            out_specs=pl.BlockSpec((batch_tile, _LANE), lambda i: (i, 0)),
            compiler_params=pltpu.CompilerParams(
                dimension_semantics=("parallel",)),
        )(*args)
    else:
        # Small-batch path: no grid, everything resident in VMEM, one launch.
        vmem = pl.BlockSpec(memory_space=pltpu.MemorySpace.VMEM)
        y_pad = pl.pallas_call(
            kernel,
            out_shape=jax.ShapeDtypeStruct((B, _LANE), x.dtype),
            in_specs=[vmem] * 7,
            out_specs=vmem,
        )(*args)

    return y_pad[:, :1]


class PallasMLP:
    """MLP: Linear(IN->H) + ReLU, L x (Linear(H->H) + ReLU), Linear(H->1)."""

    def __init__(self, inputs_size, hidden_size, hidden_layers, key):
        self.layers = hidden_layers
        keys = jax.random.split(key, 2 * (hidden_layers + 2))

        def init_linear(kw, kb, fan_in, fan_out):
            # torch.nn.Linear default init: U(-1/sqrt(fan_in), 1/sqrt(fan_in))
            bound = 1.0 / jnp.sqrt(jnp.float32(fan_in))
            w = jax.random.uniform(kw, (fan_in, fan_out), jnp.float32,
                                   -bound, bound)  # already transposed layout
            b = jax.random.uniform(kb, (fan_out,), jnp.float32, -bound, bound)
            return w, b

        self.w_in, self.b_in = init_linear(keys[0], keys[1],
                                           inputs_size, hidden_size)
        hw, hb = [], []
        for i in range(hidden_layers):
            w, b = init_linear(keys[2 + 2 * i], keys[3 + 2 * i],
                               hidden_size, hidden_size)
            hw.append(w)
            hb.append(b)
        if hidden_layers > 0:
            self.w_hid = jnp.stack(hw)          # (L, H, H)
            self.b_hid = jnp.stack(hb)          # (L, H)
        else:
            self.w_hid = jnp.zeros((1, hidden_size, hidden_size), jnp.float32)
            self.b_hid = jnp.zeros((1, hidden_size), jnp.float32)
        self.w_out, self.b_out = init_linear(keys[-2], keys[-1],
                                             hidden_size, 1)

    def __call__(self, x):
        return mlp_forward(x, self.w_in, self.b_in,
                           self.w_hid, self.b_hid,
                           self.w_out, self.b_out)

    def ref_forward(self, x):
        y = jnp.maximum(x @ self.w_in + self.b_in, 0.0)
        for i in range(self.layers):
            y = jnp.maximum(y @ self.w_hid[i] + self.b_hid[i], 0.0)
        return y @ self.w_out + self.b_out


if __name__ == "__main__":
    key = jax.random.PRNGKey(0)
    k_model, k_x, k_x_big = jax.random.split(key, 3)

    inputs_size, hidden_size, hidden_layers = 16, 32, 3
    batch = 8

    model = PallasMLP(inputs_size, hidden_size, hidden_layers, k_model)

    # Small-batch (grid-free, fully VMEM-resident) path.
    x = jax.random.normal(k_x, (batch, inputs_size), jnp.float32)
    out = model(x)
    jax.block_until_ready(out)
    ref = model.ref_forward(x)
    assert out.shape == (batch, 1)
    assert jnp.allclose(out, ref, atol=1e-5, rtol=1e-5)

    # Larger-batch path exercises the batch-tiled grid ("parallel" semantics).
    x_big = jax.random.normal(k_x_big, (512, inputs_size), jnp.float32)
    out_big = model(x_big)
    jax.block_until_ready(out_big)
    ref_big = model.ref_forward(x_big)
    assert out_big.shape == (512, 1)
    assert jnp.allclose(out_big, ref_big, atol=1e-5, rtol=1e-5)

    print("KERNEL_OK")
</pallas_src>

<mosaic_0001>
module attributes {stable_mosaic.version = 11 : i64} {
  func.func @_mlp_kernel(%arg0: memref<8x16xf32, #tpu.memory_space<vmem>>, %arg1: memref<16x32xf32, #tpu.memory_space<vmem>>, %arg2: memref<1x32xf32, #tpu.memory_space<vmem>>, %arg3: memref<3x32x32xf32, #tpu.memory_space<vmem>>, %arg4: memref<3x1x32xf32, #tpu.memory_space<vmem>>, %arg5: memref<32x128xf32, #tpu.memory_space<vmem>>, %arg6: memref<1x128xf32, #tpu.memory_space<vmem>>, %arg7: memref<8x128xf32, #tpu.memory_space<vmem>>) attributes {dimension_semantics = [], scalar_prefetch = 0 : i64, scratch_operands = 0 : i64, tpu.core_type = #tpu.core_type<tc>} {
    %c0 = arith.constant 0 : index
    %c0_0 = arith.constant 0 : index
    %0 = vector.load %arg0[%c0, %c0_0] : memref<8x16xf32, #tpu.memory_space<vmem>>, vector<8x16xf32>
    %c0_1 = arith.constant 0 : index
    %c0_2 = arith.constant 0 : index
    %1 = vector.load %arg1[%c0_1, %c0_2] : memref<16x32xf32, #tpu.memory_space<vmem>>, vector<16x32xf32>
    %cst = arith.constant dense<0.000000e+00> : vector<8x32xf32>
    %2 = tpu.matmul %0, %1, %cst {dimension_numbers = #tpu.dot_dimension_numbers<[1], [0], [0], [1], [0, 0, 1, 1], [], []>} : vector<8x16xf32>, vector<16x32xf32>, vector<8x32xf32> -> vector<8x32xf32>
    %c0_3 = arith.constant 0 : index
    %c0_4 = arith.constant 0 : index
    %3 = vector.load %arg2[%c0_3, %c0_4] : memref<1x32xf32, #tpu.memory_space<vmem>>, vector<1x32xf32>
    %4 = vector.broadcast %3 : vector<1x32xf32> to vector<8x32xf32>
    %5 = arith.addf %2, %4 : vector<8x32xf32>
    %cst_5 = arith.constant 0.000000e+00 : f32
    %6 = vector.broadcast %cst_5 : f32 to vector<8x32xf32>
    %7 = arith.maximumf %5, %6 : vector<8x32xf32>
    %c0_6 = arith.constant 0 : index
    %c0_7 = arith.constant 0 : index
    %c0_8 = arith.constant 0 : index
    %8 = vector.load %arg3[%c0_6, %c0_7, %c0_8] : memref<3x32x32xf32, #tpu.memory_space<vmem>>, vector<1x32x32xf32>
    %9 = vector.shape_cast %8 : vector<1x32x32xf32> to vector<32x32xf32>
    %cst_9 = arith.constant dense<0.000000e+00> : vector<8x32xf32>
    %10 = tpu.matmul %7, %9, %cst_9 {dimension_numbers = #tpu.dot_dimension_numbers<[1], [0], [0], [1], [0, 0, 1, 1], [], []>} : vector<8x32xf32>, vector<32x32xf32>, vector<8x32xf32> -> vector<8x32xf32>
    %c0_10 = arith.constant 0 : index
    %c0_11 = arith.constant 0 : index
    %c0_12 = arith.constant 0 : index
    %11 = vector.load %arg4[%c0_10, %c0_11, %c0_12] : memref<3x1x32xf32, #tpu.memory_space<vmem>>, vector<1x1x32xf32>
    %12 = vector.shape_cast %11 : vector<1x1x32xf32> to vector<1x32xf32>
    %13 = vector.broadcast %12 : vector<1x32xf32> to vector<8x32xf32>
    %14 = arith.addf %10, %13 : vector<8x32xf32>
    %cst_13 = arith.constant 0.000000e+00 : f32
    %15 = vector.broadcast %cst_13 : f32 to vector<8x32xf32>
    %16 = arith.maximumf %14, %15 : vector<8x32xf32>
    %c1 = arith.constant 1 : index
    %c0_14 = arith.constant 0 : index
    %c0_15 = arith.constant 0 : index
    %17 = vector.load %arg3[%c1, %c0_14, %c0_15] : memref<3x32x32xf32, #tpu.memory_space<vmem>>, vector<1x32x32xf32>
    %18 = vector.shape_cast %17 : vector<1x32x32xf32> to vector<32x32xf32>
    %cst_16 = arith.constant dense<0.000000e+00> : vector<8x32xf32>
    %19 = tpu.matmul %16, %18, %cst_16 {dimension_numbers = #tpu.dot_dimension_numbers<[1], [0], [0], [1], [0, 0, 1, 1], [], []>} : vector<8x32xf32>, vector<32x32xf32>, vector<8x32xf32> -> vector<8x32xf32>
    %c1_17 = arith.constant 1 : index
    %c0_18 = arith.constant 0 : index
    %c0_19 = arith.constant 0 : index
    %20 = vector.load %arg4[%c1_17, %c0_18, %c0_19] : memref<3x1x32xf32, #tpu.memory_space<vmem>>, vector<1x1x32xf32>
    %21 = vector.shape_cast %20 : vector<1x1x32xf32> to vector<1x32xf32>
    %22 = vector.broadcast %21 : vector<1x32xf32> to vector<8x32xf32>
    %23 = arith.addf %19, %22 : vector<8x32xf32>
    %cst_20 = arith.constant 0.000000e+00 : f32
    %24 = vector.broadcast %cst_20 : f32 to vector<8x32xf32>
    %25 = arith.maximumf %23, %24 : vector<8x32xf32>
    %c2 = arith.constant 2 : index
    %c0_21 = arith.constant 0 : index
    %c0_22 = arith.constant 0 : index
    %26 = vector.load %arg3[%c2, %c0_21, %c0_22] : memref<3x32x32xf32, #tpu.memory_space<vmem>>, vector<1x32x32xf32>
    %27 = vector.shape_cast %26 : vector<1x32x32xf32> to vector<32x32xf32>
    %cst_23 = arith.constant dense<0.000000e+00> : vector<8x32xf32>
    %28 = tpu.matmul %25, %27, %cst_23 {dimension_numbers = #tpu.dot_dimension_numbers<[1], [0], [0], [1], [0, 0, 1, 1], [], []>} : vector<8x32xf32>, vector<32x32xf32>, vector<8x32xf32> -> vector<8x32xf32>
    %c2_24 = arith.constant 2 : index
    %c0_25 = arith.constant 0 : index
    %c0_26 = arith.constant 0 : index
    %29 = vector.load %arg4[%c2_24, %c0_25, %c0_26] : memref<3x1x32xf32, #tpu.memory_space<vmem>>, vector<1x1x32xf32>
    %30 = vector.shape_cast %29 : vector<1x1x32xf32> to vector<1x32xf32>
    %31 = vector.broadcast %30 : vector<1x32xf32> to vector<8x32xf32>
    %32 = arith.addf %28, %31 : vector<8x32xf32>
    %cst_27 = arith.constant 0.000000e+00 : f32
    %33 = vector.broadcast %cst_27 : f32 to vector<8x32xf32>
    %34 = arith.maximumf %32, %33 : vector<8x32xf32>
    %c0_28 = arith.constant 0 : index
    %c0_29 = arith.constant 0 : index
    %35 = vector.load %arg5[%c0_28, %c0_29] : memref<32x128xf32, #tpu.memory_space<vmem>>, vector<32x128xf32>
    %cst_30 = arith.constant dense<0.000000e+00> : vector<8x128xf32>
    %36 = tpu.matmul %34, %35, %cst_30 {dimension_numbers = #tpu.dot_dimension_numbers<[1], [0], [0], [1], [0, 0, 1, 1], [], []>} : vector<8x32xf32>, vector<32x128xf32>, vector<8x128xf32> -> vector<8x128xf32>
    %c0_31 = arith.constant 0 : index
    %c0_32 = arith.constant 0 : index
    %37 = vector.load %arg6[%c0_31, %c0_32] : memref<1x128xf32, #tpu.memory_space<vmem>>, vector<1x128xf32>
    %38 = vector.broadcast %37 : vector<1x128xf32> to vector<8x128xf32>
    %39 = arith.addf %36, %38 : vector<8x128xf32>
    %c0_33 = arith.constant 0 : index
    %c0_34 = arith.constant 0 : index
    %40 = vector.load %arg7[%c0_33, %c0_34] : memref<8x128xf32, #tpu.memory_space<vmem>>, vector<8x128xf32>
    tpu.vector_store %arg7[%c0_33, %c0_34], %39 {strides = array<i32>} : memref<8x128xf32, #tpu.memory_space<vmem>>, vector<8x128xf32>,
    return
  }
}

</mosaic_0001>

<bundles_post_ra>
// kernel: tpu_custom_call.1
= control target key start
LH: loop header
LB: loop body
LE: loop exit
PB: predicated region body
PF: predicated region fallthrough
CT: control target
= control target key end

     0   :  { %12 = vsyncpa [#allocation3], 0  ;;  %s539_s0 = inlined_call_operand.hbm [shape: f32[8,16], index: 0, kind: input, shape index: {}]   ;;  %s540_s1 = inlined_call_operand.hbm [shape: f32[16,32], index: 1, kind: input, shape index: {}]   ;;  %s541_s2 = inlined_call_operand.hbm [shape: f32[1,32], index: 2, kind: input, shape index: {}]   ;;  %s542_s3 = inlined_call_operand.hbm [shape: f32[3,32,32], index: 3, kind: input, shape index: {}]   ;;  %s543_s4 = inlined_call_operand.vmem [shape: f32[3,1,32], index: 4, kind: input, shape index: {}]   ;;  %s544_s5 = inlined_call_operand.hbm [shape: f32[32,128], index: 5, kind: input, shape index: {}]   ;;  %s545_s6 = inlined_call_operand.vmem [shape: f32[1,128], index: 6, kind: input, shape index: {}]   ;;  %s546_s7 = inlined_call_operand.hbm [shape: f32[8,128], index: 7, kind: output, shape index: {}]  }
   0x1   :  { %13 = vsyncpa [#allocation6], 0 }
   0x2   :  { %14 = vsyncpa [#allocation9], 0  ;;  %s31_s26 = sshll.u32 %s540_s1, 4  ;;  %s32_s26 = int_to_ptr.hbm [resolvable:$true] %s31_s26 }
   0x3   :  { %15 = vsyncpa [#allocation4], 0  ;;  %s457_s27 = smov [#allocation5]   ;;  %s55_s8 = sshll.u32 %s542_s3, 4  ;;  %s56_s8 = int_to_ptr.hbm [resolvable:$true] %s55_s8 }
   0x4   :  { %s33_s28 = sshll.u32 %s457_s27, 4  ;;  %s458_s9 = smov 128   ;;  %s34_s28 = int_to_ptr.vmem [resolvable:$true] %s33_s28 }
   0x5   :  { %s459_s10 = smov 8   ;;  %s460_s11 = smov [#allocation8]  }
   0x6   :  { %39 = dma.hbm_to_vmem [thread:$0]  %s32_s26, 256, %s34_s28, [#allocation6], %s458_s9, %s458_s9, %s459_s10  }
   0x7   :  { %s57_s12 = sshll.u32 %s460_s11, 4  ;;  %s21_s15 = sshll.u32 %s539_s0, 4  ;;  %s58_s12 = int_to_ptr.vmem [resolvable:$true] %s57_s12  ;;  %s22_s15 = int_to_ptr.hbm [resolvable:$true] %s21_s15 }
   0x8   :  { %63 = dma.hbm_to_vmem [thread:$0]  %s56_s8, 1536, %s58_s12, [#allocation9], %s458_s9, %s458_s9, %s459_s10  }
   0x9   :  { %s45_s17 = sshll.u32 %s541_s2, 4  ;;  %s461_s18 = smov [#allocation2]   ;;  %s46_s17 = int_to_ptr.hbm [resolvable:$true] %s45_s17 }
   0xa   :  { %s23_s19 = sshll.u32 %s461_s18, 4  ;;  %s462_s3 = smov [#allocation7]   ;;  %s24_s19 = int_to_ptr.vmem [resolvable:$true] %s23_s19 }
   0xb   :  { %26 = dma.hbm_to_vmem [thread:$0]  %s22_s15, 128, %s24_s19, [#allocation3]  }
   0xc   :  { %s47_s20 = sshll.u32 %s462_s3, 4  ;;  %s70_s23 = sshll.u32 %s544_s5, 4  ;;  %s48_s20 = int_to_ptr.vmem [resolvable:$true] %s47_s20  ;;  %s71_s23 = int_to_ptr.hbm [resolvable:$true] %s70_s23 }
   0xd   :  { %50 = dma.hbm_to_vmem [thread:$0]  %s46_s17, 16, %s48_s20, [#allocation6]  }
   0xe   :  { %s463_s0 = smov [#allocation10]  }
   0xf   :  { %s72_s24 = sshll.u32 %s463_s0, 4  ;;  %s73_s24 = int_to_ptr.vmem [resolvable:$true] %s72_s24 }
  0x10   :  { %78 = dma.hbm_to_vmem [thread:$0]  %s71_s23, 512, %s73_s24, [#allocation9], %s458_s9, %s458_s9, %s459_s10  }
  0x11   :  { %449 = dma.done.wait [#allocation3], 128  }
  0x12   :  { %450 = vsyncadd [#allocation3], 4294967168 }
  0x13   :  { %451 = dma.done.wait [#allocation6], 272  }
  0x14   :  { %452 = vsyncadd [#allocation6], 4294967024 }
  0x15   :  { %453 = dma.done.wait [#allocation9], 2048  }
  0x16   :  { %454 = vsyncadd [#allocation9], 4294965248  ;;  %v103_v0 = vld [vmem:[#allocation5 + $0x8] sm:$0xff]  ;;  %v102_v1 = vld [vmem:[#allocation5] sm:$0xff]  ;;  %vm108_vm0 = vcmask 130048   ;;  %vm141_vm1 = vcmask 261120  }
  0x17   :  { %126 = vmatpush.msra.mxu0 %v103_v0  ;;  %v101_v2 = vld [vmem:[#allocation2] sm:$0xff]  ;;  %v136_v3 = vld [vmem:[#allocation8 + $0x18] sm:$0xff]  ;;  %v135_v4 = vld [vmem:[#allocation8 + $0x10] sm:$0xff]  ;;  %s464_s8 = smov [#allocation11]   ;;  %s273_s12 = sshll.u32 %s546_s7, 4  ;;  %s274_s12 = int_to_ptr.hbm [resolvable:$true] %s273_s12 }
  0x18   :  { %157 = vmatpush.msra.mxu1 %v136_v3  ;;  %v134_v5 = vld [vmem:[#allocation8 + $0x8] sm:$0xff]  ;;  %v133_v6 = vld [vmem:[#allocation8] sm:$0xff]  ;;  %v170_v7 = vld [vmem:[#allocation8 + $0x38] sm:$0xff]  ;;  %s271_s9 = sshll.u32 %s464_s8, 4  ;;  %s272_s9 = int_to_ptr.vmem [resolvable:$true] %s271_s9 }
  0x19   :  { %127 = vmatpush.msra.mxu0 %v102_v1  ;;  %191 = vmatpush.msra.mxu2 %v170_v7  ;;  %v300_v8 = vld [vmem:[#allocation7] ss:$0 sm:$0xff]  ;;  %v169_v12 = vld [vmem:[#allocation8 + $0x30] sm:$0xff]  ;;  %v168_v13 = vld [vmem:[#allocation8 + $0x28] sm:$0xff] }
  0x1a   :  { %285 = vmatmul.msk.f32.vlgmr.msra.gmra.mxu0 %vm108_vm0, %v101_v2  ;;  %158 = vmatpush.msra.mxu1 %v135_v4  ;;  %v167_v14 = vld [vmem:[#allocation8 + $0x20] sm:$0xff]  ;;  %v204_v15 = vld [vmem:[#allocation8 + $0x58] sm:$0xff]  ;;  %v203_v20 = vld [vmem:[#allocation8 + $0x50] sm:$0xff] }
  0x1b   :  { %192 = vmatpush.msra.mxu2 %v169_v12  ;;  %225 = vmatpush.msra.mxu3 %v204_v15  ;;  %v301_v16 = vld [vmem:[%s543_s4] ss:$0 sm:$0xff]  ;;  %v202_v21 = vld [vmem:[#allocation8 + $0x48] sm:$0xff]  ;;  %v237_v23 = vld [vmem:[#allocation10 + $0x18] sm:$0xff] }
  0x1c   :  { %159 = vmatpush.msra.mxu1 %v134_v5  ;;  %v201_v22 = vld [vmem:[#allocation8 + $0x40] sm:$0xff]  ;;  %v236_v24 = vld [vmem:[#allocation10 + $0x10] sm:$0xff]  ;;  %257 = vmatpush.msrb.mxu0 %v237_v23  ;;  %v235_v29 = vld [vmem:[#allocation10 + $0x8] sm:$0xff] }
  0x1d   :  { %193 = vmatpush.msra.mxu2 %v168_v13  ;;  %226 = vmatpush.msra.mxu3 %v203_v20  ;;  %v302_v25 = vld [vmem:[%s543_s4 + $0x1] ss:$0 sm:$0xff]  ;;  %v303_v31 = vld [vmem:[%s543_s4 + $0x2] ss:$0 sm:$0xff]  ;;  %v304_v35 = vld [vmem:[%s545_s6] ss:$0 sm:$0xff] }
  0x1e   :  { %160 = vmatpush.msra.mxu1 %v133_v6  ;;  %258 = vmatpush.msrb.mxu0 %v236_v24  ;;  %v234_v30 = vld [vmem:[#allocation10] sm:$0xff] }
  0x1f   :  { %194 = vmatpush.msra.mxu2 %v167_v14  ;;  %227 = vmatpush.msra.mxu3 %v202_v21 }
  0x20   :  { %259 = vmatpush.msrb.mxu0 %v235_v29 }
  0x21   :  { %228 = vmatpush.msra.mxu3 %v201_v22 }
  0x22   :  { %260 = vmatpush.msrb.mxu0 %v234_v30 }
  0x97   :  { %v129_v9 = vpop.f32.mrf.mxu0 }
  0x98   :  { %v130_v10 = vadd.f32 %v300_v8, %v129_v9 }
  0x9a   :  { %v132_v11 = vmax.f32 %v130_v10, 0.0 }
  0x9c   :  { %286 = vmatmul.msk.f32.vlgmr.msra.gmra.mxu1 %vm141_vm1, %v132_v11 }
 0x119   :  { %v162_v17 = vpop.f32.mrf.mxu1 }
 0x11a   :  { %v163_v18 = vadd.f32 %v301_v16, %v162_v17 }
 0x11c   :  { %v165_v19 = vmax.f32 %v163_v18, 0.0 }
 0x11e   :  { %288 = vmatmul.msk.f32.vlgmr.msra.gmra.mxu2 %vm141_vm1, %v165_v19 }
 0x1a1   :  { %v196_v26 = vpop.f32.mrf.mxu2 }
 0x1a2   :  { %v197_v27 = vadd.f32 %v302_v25, %v196_v26 }
 0x1a4   :  { %v199_v28 = vmax.f32 %v197_v27, 0.0 }
 0x1a6   :  { %290 = vmatmul.msk.f32.vlgmr.msra.gmra.mxu3 %vm141_vm1, %v199_v28 }
 0x229   :  { %v230_v32 = vpop.f32.mrf.mxu3 }
 0x22a   :  { %v231_v33 = vadd.f32 %v303_v31, %v230_v32 }
 0x22c   :  { %v233_v34 = vmax.f32 %v231_v33, 0.0 }
 0x22e   :  { %291 = vmatmul.msk.f32.vlgmr.msrb.gmra.mxu0 %vm141_vm1, %v233_v34 }
 0x2ab   :  { %v262_v36 = vpop.f32.mrf.mxu0 }
 0x2ac   :  { %v263_v37 = vadd.f32 %v304_v35, %v262_v36 }
 0x2ae   :  { %265 = vst [vmem:[#allocation11] sm:$0xff] %v263_v37 }
 0x2af   :  { %276 = dma.vmem_to_hbm [thread:$0]  %s272_s9, 128, %s274_s12, [#allocation4]  }
 0x2b0   :  { %455 = dma.done.wait [#allocation4], 128  }
 0x2b1   :  { %456 = vsyncadd [#allocation4], 4294967168 }
 0x2b2   :  { %281 = vsyncpa [#allocation3], 1 }
 0x2b3   :  { %282 = vsyncpa [#allocation6], 1 }
 0x2b4   :  { %283 = vsyncpa [#allocation9], 1 }
 0x2b5   :  { %284 = vsyncpa [#allocation4], 1 }

</bundles_post_ra>
